<compile_context>
chip_gen: v5e
topology: v5e:2x2
jax: 0.10.0
libtpu: 0.0.40
codegen_flags: <defaults>
</compile_context>

<pallas_src>
import jax
import jax.numpy as jnp
from jax.experimental import pallas as pl
from jax.experimental.pallas import tpu as pltpu

LANE = 128        # hidden dim padded to a multiple of the lane width
ROW_ALIGN = 16    # bf16 packs 2 rows per sublane -> row tiles multiple of 16


def _round_up(n, m):
    return ((n + m - 1) // m) * m


def qnetwork_kernel(x_ref, w1_ref, b1_ref, w2_ref, b2_ref, w3_ref, b3_ref, o_ref):
    """Fused 3-layer MLP on one (tb, d_in) row tile; h1/h2 never leave VMEM."""
    # Layer 1: (tb, d_in) bf16 @ (d_in, H_p) bf16 -> f32 acc, +bias, ReLU.
    h1 = jnp.dot(x_ref[...], w1_ref[...], preferred_element_type=jnp.float32)
    h1 = jnp.maximum(h1 + b1_ref[...], 0.0)

    # Layer 2: (tb, H_p) @ (H_p, H_p) -> f32 acc, +bias, ReLU.
    h2 = jnp.dot(h1.astype(jnp.bfloat16), w2_ref[...],
                 preferred_element_type=jnp.float32)
    h2 = jnp.maximum(h2 + b2_ref[...], 0.0)

    # Layer 3: (tb, H_p) @ (H_p, d_out) -> f32 acc, +bias, no activation.
    out = jnp.dot(h2.astype(jnp.bfloat16), w3_ref[...],
                  preferred_element_type=jnp.float32)
    o_ref[...] = (out + b3_ref[...]).astype(o_ref.dtype)


def qnetwork_forward(x, params, *, block_rows=1024):
    """Fused 3-layer MLP forward, gridded over the batch (row) dimension.

    x: (B, input_dim) float32
    params: dict from init_params (bf16 weights, f32 biases).
    Returns (B, output_dim) float32.
    """
    B, d_in = x.shape
    assert d_in == params["d_in"]
    d_out = params["d_out"]
    w1, b1 = params["w1"], params["b1"]
    w2, b2 = params["w2"], params["b2"]
    w3, b3 = params["w3"], params["b3"]

    # ---- row tiling -----------------------------------------------------
    # Pad rows only to the bf16 row-tile alignment (<= 15 wasted rows per
    # tile, not up to block_rows - 1), and force >= 2 grid steps whenever the
    # batch allows so v7x's two TensorCores both get work.
    b8 = _round_up(B, ROW_ALIGN)
    n_tiles = pl.cdiv(b8, block_rows)
    if b8 >= 2 * ROW_ALIGN:
        n_tiles = max(n_tiles, 2)
    tb = _round_up(pl.cdiv(b8, n_tiles), ROW_ALIGN)
    b_pad = tb * n_tiles

    # Input streamed as bf16 at its logical lane width; padded rows are zero
    # and are sliced off below (no cross-row reduction inside the kernel).
    x_p = jnp.pad(x.astype(jnp.bfloat16), ((0, b_pad - B), (0, 0)))

    # Weights/biases: full-array blocks + constant index_map -> DMA'd once,
    # VMEM-resident across all grid steps.
    resident = lambda a: pl.BlockSpec(a.shape, lambda i: (0,) * a.ndim)

    out = pl.pallas_call(
        qnetwork_kernel,
        out_shape=jax.ShapeDtypeStruct((b_pad, d_out), jnp.float32),
        grid=(b_pad // tb,),
        in_specs=[
            pl.BlockSpec((tb, d_in), lambda i: (i, 0)),   # x: tiled over rows
            resident(w1), resident(b1),
            resident(w2), resident(b2),
            resident(w3), resident(b3),
        ],
        out_specs=pl.BlockSpec((tb, d_out), lambda i: (i, 0)),
        compiler_params=pltpu.CompilerParams(
            dimension_semantics=("parallel",),   # shard batch tiles across TCs
        ),
    )(x_p, w1, b1, w2, b2, w3, b3)

    return out[:B]


def init_params(key, input_dim, output_dim, hidden_dim=64):
    """PyTorch-style uniform fan-in init.

    Only the hidden dim is padded (to 128 lanes); input/output widths stay at
    their logical sizes so the streamed tensors carry no padding.  Weights are
    stored bf16 (MXU-native operands, halved HBM/VMEM traffic); biases stay
    f32 for the f32 epilogue.  Padded hidden rows/columns are zero, so the
    padded network computes exactly the same logical outputs.
    """
    h_p = _round_up(hidden_dim, LANE)

    def linear(k, fan_in, fan_out, fan_in_p, fan_out_p):
        kw, kb = jax.random.split(k)
        bound = 1.0 / jnp.sqrt(jnp.float32(fan_in))
        w = jax.random.uniform(kw, (fan_in, fan_out), jnp.float32, -bound, bound)
        b = jax.random.uniform(kb, (1, fan_out), jnp.float32, -bound, bound)
        w_p = jnp.zeros((fan_in_p, fan_out_p), jnp.float32).at[:fan_in, :fan_out].set(w)
        b_p = jnp.zeros((1, fan_out_p), jnp.float32).at[:, :fan_out].set(b)
        return w_p.astype(jnp.bfloat16), b_p

    k1, k2, k3 = jax.random.split(key, 3)
    w1, b1 = linear(k1, input_dim, hidden_dim, input_dim, h_p)   # (d_in, H_p)
    w2, b2 = linear(k2, hidden_dim, hidden_dim, h_p, h_p)        # (H_p, H_p)
    w3, b3 = linear(k3, hidden_dim, output_dim, h_p, output_dim) # (H_p, d_out)
    return {"w1": w1, "b1": b1, "w2": w2, "b2": b2, "w3": w3, "b3": b3,
            "d_in": input_dim, "d_out": output_dim}


def qnetwork_ref_bf16(x, p):
    """Plain-JAX reference mirroring the kernel's bf16-operand / f32-acc math."""
    h = jnp.dot(x.astype(jnp.bfloat16), p["w1"],
                preferred_element_type=jnp.float32) + p["b1"]
    h = jnp.maximum(h, 0.0)
    h = jnp.dot(h.astype(jnp.bfloat16), p["w2"],
                preferred_element_type=jnp.float32) + p["b2"]
    h = jnp.maximum(h, 0.0)
    return jnp.dot(h.astype(jnp.bfloat16), p["w3"],
                   preferred_element_type=jnp.float32) + p["b3"]


def qnetwork_ref_f32(x, p):
    """Full-precision reference of the original PyTorch module semantics."""
    w1 = p["w1"].astype(jnp.float32)
    w2 = p["w2"].astype(jnp.float32)
    w3 = p["w3"].astype(jnp.float32)
    h = jnp.maximum(x @ w1 + p["b1"], 0.0)
    h = jnp.maximum(h @ w2 + p["b2"], 0.0)
    return h @ w3 + p["b3"]


if __name__ == "__main__":
    key = jax.random.PRNGKey(0)
    k_x, k_p = jax.random.split(key)

    # Small demo shapes consistent with the module (QMIX default hidden=64).
    # batch=50 exercises both the row-padding path (50 -> 64 rows) and a
    # multi-step grid (two 32-row tiles -> megacore-shardable on v7x).
    batch, input_dim, hidden_dim, output_dim = 50, 32, 64, 16
    x = jax.random.normal(k_x, (batch, input_dim), jnp.float32)
    params = init_params(k_p, input_dim, output_dim, hidden_dim)

    out = qnetwork_forward(x, params)
    out = jax.block_until_ready(out)
    assert out.shape == (batch, output_dim)

    # Tight check vs a reference using the same bf16-operand / f32-acc math.
    ref_bf16 = qnetwork_ref_bf16(x, params)
    assert jnp.allclose(out, ref_bf16, atol=2e-3, rtol=2e-3), "mismatch vs bf16 reference"

    # Looser sanity check vs the full-f32 original-module semantics
    # (difference is only bf16 operand rounding).
    ref_f32 = qnetwork_ref_f32(x, params)
    assert jnp.allclose(out, ref_f32, atol=5e-2, rtol=5e-2), "mismatch vs f32 reference"

    print("KERNEL_OK")
</pallas_src>

<mosaic_0001>
module attributes {stable_mosaic.version = 11 : i64} {
  func.func @qnetwork_kernel(%arg0: i32, %arg1: memref<32x32xbf16, #tpu.memory_space<vmem>>, %arg2: memref<32x128xbf16, #tpu.memory_space<vmem>>, %arg3: memref<1x128xf32, #tpu.memory_space<vmem>>, %arg4: memref<128x128xbf16, #tpu.memory_space<vmem>>, %arg5: memref<1x128xf32, #tpu.memory_space<vmem>>, %arg6: memref<128x16xbf16, #tpu.memory_space<vmem>>, %arg7: memref<1x16xf32, #tpu.memory_space<vmem>>, %arg8: memref<32x16xf32, #tpu.memory_space<vmem>>) attributes {dimension_semantics = [#tpu.dimension_semantics<parallel>], iteration_bounds = array<i64: 2>, scalar_prefetch = 0 : i64, scratch_operands = 0 : i64, tpu.core_type = #tpu.core_type<tc>, window_params = [{transform_indices = @transform_0, window_bounds = array<i64: 32, 32>}, {pipeline_mode = #tpu.pipeline_mode<synchronous>, transform_indices = @transform_1, window_bounds = array<i64: 32, 128>}, {pipeline_mode = #tpu.pipeline_mode<synchronous>, transform_indices = @transform_2, window_bounds = array<i64: 1, 128>}, {pipeline_mode = #tpu.pipeline_mode<synchronous>, transform_indices = @transform_3, window_bounds = array<i64: 128, 128>}, {pipeline_mode = #tpu.pipeline_mode<synchronous>, transform_indices = @transform_4, window_bounds = array<i64: 1, 128>}, {pipeline_mode = #tpu.pipeline_mode<synchronous>, transform_indices = @transform_5, window_bounds = array<i64: 128, 16>}, {pipeline_mode = #tpu.pipeline_mode<synchronous>, transform_indices = @transform_6, window_bounds = array<i64: 1, 16>}, {transform_indices = @transform_7, window_bounds = array<i64: 32, 16>}]} {
    %c0 = arith.constant 0 : index
    %c0_0 = arith.constant 0 : index
    %0 = vector.load %arg1[%c0, %c0_0] : memref<32x32xbf16, #tpu.memory_space<vmem>>, vector<32x32xbf16>
    %c0_1 = arith.constant 0 : index
    %c0_2 = arith.constant 0 : index
    %1 = vector.load %arg2[%c0_1, %c0_2] : memref<32x128xbf16, #tpu.memory_space<vmem>>, vector<32x128xbf16>
    %cst = arith.constant dense<0.000000e+00> : vector<32x128xf32>
    %2 = tpu.matmul %0, %1, %cst {dimension_numbers = #tpu.dot_dimension_numbers<[1], [0], [0], [1], [0, 0, 1, 1], [], []>} : vector<32x32xbf16>, vector<32x128xbf16>, vector<32x128xf32> -> vector<32x128xf32>
    %c0_3 = arith.constant 0 : index
    %c0_4 = arith.constant 0 : index
    %3 = vector.load %arg3[%c0_3, %c0_4] : memref<1x128xf32, #tpu.memory_space<vmem>>, vector<1x128xf32>
    %4 = vector.broadcast %3 : vector<1x128xf32> to vector<32x128xf32>
    %5 = arith.addf %2, %4 : vector<32x128xf32>
    %cst_5 = arith.constant 0.000000e+00 : f32
    %6 = vector.broadcast %cst_5 : f32 to vector<32x128xf32>
    %7 = arith.maximumf %5, %6 : vector<32x128xf32>
    %8 = arith.truncf %7 : vector<32x128xf32> to vector<32x128xbf16>
    %c0_6 = arith.constant 0 : index
    %c0_7 = arith.constant 0 : index
    %9 = vector.load %arg4[%c0_6, %c0_7] : memref<128x128xbf16, #tpu.memory_space<vmem>>, vector<128x128xbf16>
    %cst_8 = arith.constant dense<0.000000e+00> : vector<32x128xf32>
    %10 = tpu.matmul %8, %9, %cst_8 {dimension_numbers = #tpu.dot_dimension_numbers<[1], [0], [0], [1], [0, 0, 1, 1], [], []>} : vector<32x128xbf16>, vector<128x128xbf16>, vector<32x128xf32> -> vector<32x128xf32>
    %c0_9 = arith.constant 0 : index
    %c0_10 = arith.constant 0 : index
    %11 = vector.load %arg5[%c0_9, %c0_10] : memref<1x128xf32, #tpu.memory_space<vmem>>, vector<1x128xf32>
    %12 = vector.broadcast %11 : vector<1x128xf32> to vector<32x128xf32>
    %13 = arith.addf %10, %12 : vector<32x128xf32>
    %cst_11 = arith.constant 0.000000e+00 : f32
    %14 = vector.broadcast %cst_11 : f32 to vector<32x128xf32>
    %15 = arith.maximumf %13, %14 : vector<32x128xf32>
    %16 = arith.truncf %15 : vector<32x128xf32> to vector<32x128xbf16>
    %c0_12 = arith.constant 0 : index
    %c0_13 = arith.constant 0 : index
    %17 = vector.load %arg6[%c0_12, %c0_13] : memref<128x16xbf16, #tpu.memory_space<vmem>>, vector<128x16xbf16>
    %cst_14 = arith.constant dense<0.000000e+00> : vector<32x16xf32>
    %18 = tpu.matmul %16, %17, %cst_14 {dimension_numbers = #tpu.dot_dimension_numbers<[1], [0], [0], [1], [0, 0, 1, 1], [], []>} : vector<32x128xbf16>, vector<128x16xbf16>, vector<32x16xf32> -> vector<32x16xf32>
    %c0_15 = arith.constant 0 : index
    %c0_16 = arith.constant 0 : index
    %19 = vector.load %arg7[%c0_15, %c0_16] : memref<1x16xf32, #tpu.memory_space<vmem>>, vector<1x16xf32>
    %20 = vector.broadcast %19 : vector<1x16xf32> to vector<32x16xf32>
    %21 = arith.addf %18, %20 : vector<32x16xf32>
    %c0_17 = arith.constant 0 : index
    %c0_18 = arith.constant 0 : index
    %22 = vector.load %arg8[%c0_17, %c0_18] : memref<32x16xf32, #tpu.memory_space<vmem>>, vector<32x16xf32>
    tpu.vector_store %arg8[%c0_17, %c0_18], %21 {strides = array<i32>} : memref<32x16xf32, #tpu.memory_space<vmem>>, vector<32x16xf32>,
    return
  }
  func.func @transform_0(%arg0: i32) -> (i32, i32) {
    %c0_i32 = arith.constant 0 : i32
    %c0_i32_0 = arith.constant 0 : i32
    return %arg0, %c0_i32 : i32, i32
  }
  func.func @transform_1(%arg0: i32) -> (i32, i32) {
    %c0_i32 = arith.constant 0 : i32
    %c0_i32_0 = arith.constant 0 : i32
    %c0_i32_1 = arith.constant 0 : i32
    return %c0_i32, %c0_i32_0 : i32, i32
  }
  func.func @transform_2(%arg0: i32) -> (i32, i32) {
    %c0_i32 = arith.constant 0 : i32
    %c0_i32_0 = arith.constant 0 : i32
    %c0_i32_1 = arith.constant 0 : i32
    return %c0_i32, %c0_i32_0 : i32, i32
  }
  func.func @transform_3(%arg0: i32) -> (i32, i32) {
    %c0_i32 = arith.constant 0 : i32
    %c0_i32_0 = arith.constant 0 : i32
    %c0_i32_1 = arith.constant 0 : i32
    return %c0_i32, %c0_i32_0 : i32, i32
  }
  func.func @transform_4(%arg0: i32) -> (i32, i32) {
    %c0_i32 = arith.constant 0 : i32
    %c0_i32_0 = arith.constant 0 : i32
    %c0_i32_1 = arith.constant 0 : i32
    return %c0_i32, %c0_i32_0 : i32, i32
  }
  func.func @transform_5(%arg0: i32) -> (i32, i32) {
    %c0_i32 = arith.constant 0 : i32
    %c0_i32_0 = arith.constant 0 : i32
    %c0_i32_1 = arith.constant 0 : i32
    return %c0_i32, %c0_i32_0 : i32, i32
  }
  func.func @transform_6(%arg0: i32) -> (i32, i32) {
    %c0_i32 = arith.constant 0 : i32
    %c0_i32_0 = arith.constant 0 : i32
    %c0_i32_1 = arith.constant 0 : i32
    return %c0_i32, %c0_i32_0 : i32, i32
  }
  func.func @transform_7(%arg0: i32) -> (i32, i32) {
    %c0_i32 = arith.constant 0 : i32
    %c0_i32_0 = arith.constant 0 : i32
    return %arg0, %c0_i32 : i32, i32
  }
}

</mosaic_0001>

<bundles_post_ra>
// kernel: tpu_custom_call.1
= control target key start
LH: loop header
LB: loop body
LE: loop exit
PB: predicated region body
PF: predicated region fallthrough
CT: control target
= control target key end

     0   :  { %s778_s24 = smov 0   ;;  %s862_s0 = inlined_call_operand.vmem [shape: bf16[64,32], index: 0, kind: input, shape index: {}]   ;;  %s863_s1 = inlined_call_operand.vmem [shape: bf16[32,128], index: 1, kind: input, shape index: {}]   ;;  %s864_s2 = inlined_call_operand.vmem [shape: f32[1,128], index: 2, kind: input, shape index: {}]   ;;  %s865_s3 = inlined_call_operand.vmem [shape: bf16[128,128], index: 3, kind: input, shape index: {}]   ;;  %s866_s4 = inlined_call_operand.vmem [shape: f32[1,128], index: 4, kind: input, shape index: {}]   ;;  %s867_s5 = inlined_call_operand.vmem [shape: bf16[128,16], index: 5, kind: input, shape index: {}]   ;;  %s868_s6 = inlined_call_operand.vmem [shape: f32[1,16], index: 6, kind: input, shape index: {}]   ;;  %s869_s7 = inlined_call_operand.vmem [shape: f32[64,16], index: 7, kind: output, shape index: {}]  }
   0x1 LB: > { %s590_s25 = sadd.s32 4294967295, %s736_s24   ;;  %p594_p0 = scmp.ge.s32.totalorder %s736_s24, 1  ;;  %s736_s24 = sphi %s778_s24, %s17_s24  }
   0x2   : > { %p238_p1 = scmp.lt.s32.totalorder %s736_s24, 3 }
   0x4   : > { %p239_p2 = pnand %p594_p0, %p238_p1 }
   0x5   : > { %s595_s28 = sshll.u32 (!%p239_p2), %s590_s25, 2 }
   0x6   : > { %242 = sbr.rel (%p239_p2) target bundleno = 464 (0x1d0), region = 48  ;;  %p271_p3 = scmp.lt.s32.totalorder (!%p239_p2), %s595_s28, 7 }
   0xb   : > { %v686_v0 = vld [vmem:[%s863_s1 + $0x8] sm:$0xff]  ;;  %v694_v1 = vld [vmem:[%s865_s3 + $0x38] sm:$0xff]  ;;  %v685_v2 = vld [vmem:[%s863_s1] sm:$0xff]  ;;  %s871_s28 = smov (!%p271_p3, %s595_s28), 7  ;;  %vm317_vm0 = vcmask 261120   ;;  %vm529_vm1 = vcmask 130048  }
   0xc   : > { %330 = vmatpush.bf16.msra.mxu0 %v686_v0  ;;  %417 = vmatpush.bf16.msra.mxu1 %v694_v1  ;;  %v693_v3 = vld [vmem:[%s865_s3 + $0x30] sm:$0xff]  ;;  %s596_s12 = sshll.u32 %s871_s28, 2  ;;  %v692_v4 = vld [vmem:[%s865_s3 + $0x28] sm:$0xff]  ;;  %v691_v6 = vld [vmem:[%s865_s3 + $0x20] sm:$0xff]  ;;  %s598_s29 = sshll.u32 %s871_s28, 3 }
   0xd   : > { %703 = vmatpush.bf16.msra.mxu3 %v694_v1  ;;  %s274_s15 = scalar_lea.vmem %s862_s0, %s596_s12  ;;  %v690_v8 = vld [vmem:[%s865_s3 + $0x18] sm:$0xff]  ;;  %v689_v9 = vld [vmem:[%s865_s3 + $0x10] sm:$0xff]  ;;  %v688_v10 = vld [vmem:[%s865_s3 + $0x8] sm:$0xff]  ;;  %s280_s11 = scalar_lea.vmem %s869_s7, %s598_s29 }
   0xe   : > { %v683_v5 = vld [vmem:[%s274_s15] sm:$0xff]  ;;  %v684_v7 = vld [vmem:[%s274_s15 + $0x8] sm:$0xff]  ;;  %v702_v12 = vld [vmem:[%s867_s5 + $0x38] sm:$0xff] }
   0xf   : > { %v687_v11 = vld [vmem:[%s865_s3] sm:$0xff]  ;;  %v701_v14 = vld [vmem:[%s867_s5 + $0x30] sm:$0xff]  ;;  %711 = vmatpush.bf16.msra.mxu2 %v702_v12  ;;  %v700_v16 = vld [vmem:[%s867_s5 + $0x28] sm:$0xff] }
  0x10   : > { %331 = vmatpush.bf16.msra.mxu0 %v685_v2  ;;  %418 = vmatpush.bf16.msra.mxu1 %v693_v3  ;;  %v727_v15 = vld [vmem:[%s864_s2] ss:$0 sm:$0xff]  ;;  %v698_v31 = vld [vmem:[%s867_s5 + $0x18] sm:$0xff]  ;;  %v697_v32 = vld [vmem:[%s867_s5 + $0x10] sm:$0xff] }
  0x11   : > { %704 = vmatpush.bf16.msra.mxu3 %v693_v3  ;;  %v699_v20 = vld [vmem:[%s867_s5 + $0x20] sm:$0xff]  ;;  %v696_v33 = vld [vmem:[%s867_s5 + $0x8] sm:$0xff] }
  0x12   : > { %v695_v34 = vld [vmem:[%s867_s5] sm:$0xff] }
  0x13   : > { %615 = vmatmul.msk.bf16.vlgmr.msra.gmra.mxu0 %vm317_vm0, %v683_v5  ;;  %712 = vmatpush.bf16.msra.mxu2 %v701_v14  ;;  %v728_v36 = vld [vmem:[%s866_s4] ss:$0 sm:$0xff] }
  0x14   : > { %419 = vmatpush.bf16.msra.mxu1 %v692_v4  ;;  %510 = vmatpush.bf16.msrb.mxu0 %v702_v12  ;;  %v729_v50 = vld [vmem:[%s868_s6] ss:$0 sm:$0xff] }
  0x15   : > { %705 = vmatpush.bf16.msra.mxu3 %v692_v4 }
  0x17   : > { %713 = vmatpush.bf16.msra.mxu2 %v700_v16 }
  0x18   : > { %420 = vmatpush.bf16.msra.mxu1 %v691_v6  ;;  %511 = vmatpush.bf16.msrb.mxu0 %v701_v14 }
  0x19   : > { %706 = vmatpush.bf16.msra.mxu3 %v691_v6 }
  0x1b   : > { %714 = vmatpush.bf16.msra.mxu2 %v699_v20 }
  0x1c   : > { %421 = vmatpush.bf16.msra.mxu1 %v690_v8  ;;  %512 = vmatpush.bf16.msrb.mxu0 %v700_v16 }
  0x1d   : > { %707 = vmatpush.bf16.msra.mxu3 %v690_v8 }
  0x1f   : > { %715 = vmatpush.bf16.msra.mxu2 %v698_v31 }
  0x20   : > { %422 = vmatpush.bf16.msra.mxu1 %v689_v9  ;;  %513 = vmatpush.bf16.msrb.mxu0 %v699_v20 }
  0x21   : > { %708 = vmatpush.bf16.msra.mxu3 %v689_v9 }
  0x23   : > { %616 = vmatmul.msk.bf16.gmra.mxu0 %vm317_vm0, %v684_v7  ;;  %716 = vmatpush.bf16.msra.mxu2 %v697_v32 }
  0x24   : > { %423 = vmatpush.bf16.msra.mxu1 %v688_v10  ;;  %514 = vmatpush.bf16.msrb.mxu0 %v698_v31 }
  0x25   : > { %709 = vmatpush.bf16.msra.mxu3 %v688_v10 }
  0x27   : > { %717 = vmatpush.bf16.msra.mxu2 %v696_v33 }
  0x28   : > { %424 = vmatpush.bf16.msra.mxu1 %v687_v11  ;;  %515 = vmatpush.bf16.msrb.mxu0 %v697_v32 }
  0x29   : > { %710 = vmatpush.bf16.msra.mxu3 %v687_v11 }
  0x2b   : > { %718 = vmatpush.bf16.msra.mxu2 %v695_v34 }
  0x2c   : > { %516 = vmatpush.bf16.msrb.mxu0 %v696_v33 }
  0x30   : > { %517 = vmatpush.bf16.msrb.mxu0 %v695_v34 }
  0x90   : > { %v333_v13 = vpop.f32.mrf.mxu0 }
  0x91   : > { %v334_v17 = vadd.f32 %v727_v15, %v333_v13 }
  0x93   : > { %v343_v21 = vmax.f32 %v334_v17, 0.0 }
  0x98   : > { %v335_v18 = vpop.f32.mrf.mxu0 }
  0x99   : > { %v336_v19 = vadd.f32 %v727_v15, %v335_v18 }
  0x9b   : > { %v344_v22 = vmax.f32 %v336_v19, 0.0 }
  0x9d   : > { %v347_v23 = vpack.c.bf16 %v344_v22, %v343_v21 }
  0x9f   : > { %425 = vmatmul.bf16.vlgmr.msra.gmra.mxu1 %v347_v23 }
  0xa0   : > { %v338_v24 = vpop.f32.mrf.mxu0 }
  0xa1   : > { %v339_v25 = vadd.f32 %v727_v15, %v338_v24 }
  0xa3   : > { %v345_v28 = vmax.f32 %v339_v25, 0.0 }
  0xa8   : > { %v340_v26 = vpop.f32.mrf.mxu0 }
  0xa9   : > { %v341_v27 = vadd.f32 %v727_v15, %v340_v26 }
  0xab   : > { %v346_v29 = vmax.f32 %v341_v27, 0.0 }
  0xad   : > { %v348_v30 = vpack.c.bf16 %v346_v29, %v345_v28 }
  0xaf   : > { %430 = vmatmul.bf16.vlgmr.msra.gmra.mxu3 %v348_v30 }
 0x11c   : > { %v426_v35 = vpop.f32.mrf.mxu1 }
 0x11d   : > { %v427_v37 = vadd.f32 %v728_v36, %v426_v35 }
 0x11f   : > { %v436_v40 = vmax.f32 %v427_v37, 0.0 }
 0x124   : > { %v428_v38 = vpop.f32.mrf.mxu1 }
 0x125   : > { %v429_v39 = vadd.f32 %v728_v36, %v428_v38 }
 0x127   : > { %v437_v41 = vmax.f32 %v429_v39, 0.0 }
 0x129   : > { %v440_v42 = vpack.c.bf16 %v437_v41, %v436_v40 }
 0x12b   : > { %518 = vmatmul.bf16.vlgmr.msrb.gmra.mxu0 %v440_v42 }
 0x132   : > { %v431_v43 = vpop.f32.mrf.mxu3 }
 0x133   : > { %v432_v44 = vadd.f32 %v728_v36, %v431_v43 }
 0x135   : > { %v438_v47 = vmax.f32 %v432_v44, 0.0 }
 0x13a   : > { %v433_v45 = vpop.f32.mrf.mxu3 }
 0x13b   : > { %v434_v46 = vadd.f32 %v728_v36, %v433_v45 }
 0x13d   : > { %v439_v48 = vmax.f32 %v434_v46, 0.0 }
 0x13f   : > { %v441_v49 = vpack.c.bf16 %v439_v48, %v438_v47 }
 0x141   : > { %523 = vmatmul.bf16.vlgmr.msra.gmra.mxu2 %v441_v49 }
 0x1a8   : > { %v519_v51 = vpop.f32.mrf.mxu0 }
 0x1a9   : > { %v520_v52 = vadd.f32 %v729_v50, %v519_v51 }
 0x1ab   : > { %530 = vst.msk [vmem:[%s280_s11] sm:$0xff] %vm529_vm1, %v520_v52 }
 0x1b0   : > { %v521_v53 = vpop.f32.mrf.mxu0 }
 0x1b1   : > { %v522_v54 = vadd.f32 %v729_v50, %v521_v53 }
 0x1b3   : > { %531 = vst.msk [vmem:[%s280_s11 + $0x8] sm:$0xff] %vm529_vm1, %v522_v54 }
 0x1c4   : > { %v524_v55 = vpop.f32.mrf.mxu2 }
 0x1c5   : > { %v525_v56 = vadd.f32 %v729_v50, %v524_v55 }
 0x1c7   : > { %532 = vst.msk [vmem:[%s280_s11 + $0x10] sm:$0xff] %vm529_vm1, %v525_v56 }
 0x1cc   : > { %v526_v57 = vpop.f32.mrf.mxu2 }
 0x1cd   : > { %v527_v58 = vadd.f32 %v729_v50, %v526_v57 }
 0x1cf   : > { %533 = vst.msk [vmem:[%s280_s11 + $0x18] sm:$0xff] %vm529_vm1, %v527_v58 }
 0x1d0 PF: > { %s17_s24 = sadd.s32 1, %s736_s24  }
 0x1d1   : > { %p14_p4 = scmp.ge.s32.totalorder %s17_s24, 4  }
 0x1d3   :  { %16 = sbr.rel (!%p14_p4) target bundleno = 1 (0x1), region = 78 }

</bundles_post_ra>
